<compile_context>
chip_gen: v7x
topology: tpu7x:2x2x1
jax: 0.10.0
libtpu: 0.0.40
codegen_flags: <defaults>
</compile_context>

<pallas_src>
import functools

import jax
import jax.numpy as jnp
from jax import lax
from jax.experimental import pallas as pl
from jax.experimental.pallas import tpu as pltpu

VOCAB_SIZE = 64      # config.vocab_size   (small synthetic)
EMB_DIM = 32         # config.emb_dim
HIDDEN_DIM = 32      # config.hidden_dim
N_GCN_LAYERS = 2     # config.n_gcn_layers (kernel unrolled for 2 layers/direction)


def _round_up(x, m):
    return (x + m - 1) // m * m


# --------------------------------------------------------------------------
# Kernel: fused embedding -> 2x(2-layer GCN) -> pool/scatter -> heads + fc.
# Constants (n, v, h, b_pad) are baked in via functools.partial.
# --------------------------------------------------------------------------
def _gcn_encoder_kernel(s_ref, p_ref, w_ref, b_ref, out_ref, *, n, v, h, b_pad):
    f32 = jnp.float32
    h2, h4 = 2 * h, 4 * h

    # ---- packed structure slab: [one-hot | A1 | A2] along lanes -------------
    onehot = s_ref[:, 0:v]                      # (N, V)
    a1 = s_ref[:, v:v + n]                      # (N, N)  flow source->target
    a2 = s_ref[:, v + n:v + 2 * n]              # (N, N)  flow target->source

    # ---- packed weight slab (static lane windows) ---------------------------
    whd = w_ref[0:h2, 0:h4]                             # (2H, 4H) = [w1|w2|w3|w4]
    ew1 = w_ref[0:v, h4:h4 + h2]                        # (V, 2H)  = emb @ [w1a|w2a]
    w2bd = w_ref[0:h2, h4 + h2:h4 + 2 * h2]             # (2H, 2H) = blkdiag(w1b,w2b)
    wfc = w_ref[0:h2, h4 + 2 * h2:h4 + 3 * h2]          # (2H, 2H)

    # lane mask selecting direction-1 (lanes < H) vs direction-2 (lanes >= H)
    left = lax.broadcasted_iota(jnp.int32, (n, h2), 1) < h

    # Layer 1 (embedding lookup + XW fused into one (N,V)x(V,2H) matmul).
    xw = jnp.dot(onehot, ew1, preferred_element_type=f32)            # (N, 2H)
    y = jnp.where(left,
                  jnp.dot(a1, xw, preferred_element_type=f32),
                  jnp.dot(a2, xw, preferred_element_type=f32)) + b_ref[0:1, 0:h2]

    # Layer 2 (block-diagonal weight -> one (N,2H)x(2H,2H) matmul).
    z = jnp.dot(y, w2bd, preferred_element_type=f32)                 # (N, 2H)
    x12 = jnp.where(left,
                    jnp.dot(a1, z, preferred_element_type=f32),
                    jnp.dot(a2, z, preferred_element_type=f32)) + b_ref[1:2, 0:h2]

    # global_mean_pool + to_dense_batch as ONE stacked matmul.
    pg = jnp.dot(p_ref[...], x12, preferred_element_type=f32)        # (B_pad+BN_pad, 2H)
    g = pg[0:b_pad, :]                                                # (B_pad, 2H)
    dense = pg[b_pad:, :]                                             # (BN_pad, 2H)

    # Fused heads w1..w4 (lane-dense 4H=128) and fc (Linear + ReLU).
    heads = jnp.dot(g, whd, preferred_element_type=f32) + b_ref[3:4, 0:h4]
    feat = jnp.maximum(
        jnp.dot(dense, wfc, preferred_element_type=f32) + b_ref[2:3, 0:h2], 0.0)

    # Single packed lane-dense output slab: unmasked 8x128-aligned stores.
    out_ref[0:b_pad, :] = heads.astype(out_ref.dtype)
    out_ref[b_pad:, :] = jnp.concatenate([dense, feat], axis=1).astype(out_ref.dtype)


# --------------------------------------------------------------------------
# Graph-structure preprocessing (PyG gcn_norm / global_mean_pool /
# to_dense_batch equivalents) -- pure index math, built once outside the kernel.
# --------------------------------------------------------------------------
def gcn_adjacency(edge_index, num_nodes):
    src, dst = edge_index[0], edge_index[1]
    a = jnp.zeros((num_nodes, num_nodes), jnp.float32).at[src, dst].add(1.0)
    # add_remaining_self_loops: only add a self-loop where none already exists.
    diag = jnp.diagonal(a)
    a_hat = a + jnp.diag(jnp.where(diag > 0.0, 0.0, 1.0))
    # flow='source_to_target': aggregate at target, degree = in-degree of A_hat
    dis = lax.rsqrt(jnp.sum(a_hat, axis=0))
    a1 = (a_hat * dis[:, None] * dis[None, :]).T          # a1[t, s]
    # flow='target_to_source': aggregate at source, degree = out-degree of A_hat
    dos = lax.rsqrt(jnp.sum(a_hat, axis=1))
    a2 = a_hat * dos[:, None] * dos[None, :]               # a2[s, t]
    return a1, a2


def batch_matrices(batch, num_graphs, max_nodes):
    n = batch.shape[0]
    node_iota = jnp.arange(n, dtype=jnp.int32)
    counts = jnp.zeros((num_graphs,), jnp.float32).at[batch].add(1.0)
    member = batch[None, :] == jnp.arange(num_graphs, dtype=jnp.int32)[:, None]
    pool = member.astype(jnp.float32) / jnp.maximum(counts[:, None], 1.0)
    counts_i = counts.astype(jnp.int32)
    starts = jnp.concatenate([jnp.zeros((1,), jnp.int32), jnp.cumsum(counts_i)[:-1]])
    pos = node_iota - starts[batch]
    rows = batch * max_nodes + pos
    scat = jnp.zeros((num_graphs * max_nodes, n), jnp.float32).at[rows, node_iota].set(1.0)
    valid_mask = jnp.arange(max_nodes, dtype=jnp.int32)[None, :] < counts_i[:, None]
    return pool, scat, valid_mask


def build_graph_operands(ids, edge_index, batch, num_graphs, max_nodes):
    """Packs one-hot / A1 / A2 into one lane-dense slab and pool / scatter into
    one stacked, sublane-padded matrix (4 HBM->VMEM DMAs total incl. weights)."""
    n = ids.shape[0]
    v = VOCAB_SIZE
    a1, a2 = gcn_adjacency(edge_index, n)
    pool, scat, valid_mask = batch_matrices(batch, num_graphs, max_nodes)
    onehot = (ids[:, None] == jnp.arange(v, dtype=jnp.int32)[None, :]).astype(jnp.float32)

    s_lanes = _round_up(v + 2 * n, 128)
    s = jnp.zeros((n, s_lanes), jnp.float32)
    s = s.at[:, 0:v].set(onehot)
    s = s.at[:, v:v + n].set(a1)
    s = s.at[:, v + n:v + 2 * n].set(a2)

    b_pad = _round_up(num_graphs, 8)
    bn = num_graphs * max_nodes
    bn_pad = _round_up(bn, 8)
    p = jnp.zeros((b_pad + bn_pad, n), jnp.float32)
    p = p.at[0:num_graphs, :].set(pool)
    p = p.at[b_pad:b_pad + bn, :].set(scat)
    return s, p, valid_mask


def pack_params(params):
    """Pre-fuse / pre-stack all weights & biases into two (8,128)-friendly slabs.
    Done once; the kernel only does static slab slices."""
    h, v = HIDDEN_DIM, VOCAB_SIZE
    h2, h4 = 2 * h, 4 * h
    # embedding folded into layer-1 weights of both directions
    ew1 = params["emb"] @ jnp.concatenate([params["w1a"], params["w2a"]], axis=1)  # (V,2H)
    w2bd = jnp.zeros((h2, h2), jnp.float32)
    w2bd = w2bd.at[:h, :h].set(params["w1b"]).at[h:, h:].set(params["w2b"])
    w_heads = jnp.concatenate(
        [params["w1"], params["w2"], params["w3"], params["w4"]], axis=1)          # (2H,4H)

    rows = max(v, h2)
    lanes = _round_up(h4 + 3 * h2, 128)
    w = jnp.zeros((rows, lanes), jnp.float32)
    w = w.at[0:h2, 0:h4].set(w_heads)
    w = w.at[0:v, h4:h4 + h2].set(ew1)
    w = w.at[0:h2, h4 + h2:h4 + 2 * h2].set(w2bd)
    w = w.at[0:h2, h4 + 2 * h2:h4 + 3 * h2].set(params["w_fc"])

    b = jnp.zeros((8, 128), jnp.float32)
    b = b.at[0, 0:h2].set(jnp.concatenate([params["b1a"], params["b2a"]]))
    b = b.at[1, 0:h2].set(jnp.concatenate([params["b1b"], params["b2b"]]))
    b = b.at[2, 0:h2].set(params["b_fc"])
    b = b.at[3, 0:h4].set(jnp.concatenate(
        [params["b_w1"], params["b_w2"], params["b_w3"], params["b_w4"]]))
    return w, b


def init_params(key):
    std = 0.1
    ks = jax.random.split(key, 21)
    nrm = lambda k, s: std * jax.random.normal(k, s, dtype=jnp.float32)
    h, d, v = HIDDEN_DIM, EMB_DIM, VOCAB_SIZE
    return {
        "emb": nrm(ks[0], (v, d)),
        "w1a": nrm(ks[1], (d, h)), "b1a": nrm(ks[2], (h,)),
        "w1b": nrm(ks[3], (h, h)), "b1b": nrm(ks[4], (h,)),
        "w2a": nrm(ks[5], (d, h)), "b2a": nrm(ks[6], (h,)),
        "w2b": nrm(ks[7], (h, h)), "b2b": nrm(ks[8], (h,)),
        "w1": nrm(ks[9], (2 * h, h)), "b_w1": nrm(ks[10], (h,)),
        "w2": nrm(ks[11], (2 * h, h)), "b_w2": nrm(ks[12], (h,)),
        "w3": nrm(ks[13], (2 * h, h)), "b_w3": nrm(ks[14], (h,)),
        "w4": nrm(ks[15], (2 * h, h)), "b_w4": nrm(ks[16], (h,)),
        "w_fc": nrm(ks[17], (2 * h, 2 * h)), "b_fc": nrm(ks[18], (2 * h,)),
    }


# --------------------------------------------------------------------------
# Wrapper: ONE pallas_call, 4 input DMAs, 1 lane-dense packed output.
# --------------------------------------------------------------------------
def gcn_encoder(s, p, w, b, *, n, num_graphs, max_nodes):
    h = HIDDEN_DIM
    h2, h4 = 2 * h, 4 * h
    v = VOCAB_SIZE
    b_pad = _round_up(num_graphs, 8)
    bn = num_graphs * max_nodes
    bn_pad = _round_up(bn, 8)

    kernel = functools.partial(_gcn_encoder_kernel, n=n, v=v, h=h, b_pad=b_pad)

    flops = 2 * (n * v * h2                      # embedding + layer1 XW (fused)
                 + 4 * n * n * h2                # A-aggregation, 2 dirs x 2 layers
                 + n * h2 * h2                   # layer2 block-diag XW
                 + (b_pad + bn_pad) * n * h2     # pool + scatter (stacked)
                 + b_pad * h2 * h4               # fused heads
                 + bn_pad * h2 * h2)             # fc
    in_bytes = 4 * (s.size + p.size + w.size + b.size)
    out_bytes = 4 * (b_pad + bn_pad) * h4

    vmem = pl.BlockSpec(memory_space=pltpu.MemorySpace.VMEM)
    out = pl.pallas_call(
        kernel,
        out_shape=jax.ShapeDtypeStruct((b_pad + bn_pad, h4), jnp.float32),
        in_specs=[vmem, vmem, vmem, vmem],
        out_specs=vmem,
        compiler_params=pltpu.CompilerParams(vmem_limit_bytes=16 * 1024 * 1024),
        cost_estimate=pl.CostEstimate(flops=flops, transcendentals=0,
                                      bytes_accessed=in_bytes + out_bytes),
    )(s, p, w, b)

    # Free wrapper-side layout plumbing of the packed output slab.
    heads = out[0:num_graphs, :]                               # (B, 4H)
    dense = out[b_pad:b_pad + bn, 0:h2]                        # (B*Nmax, 2H)
    feat = out[b_pad:b_pad + bn, h2:h4]                        # (B*Nmax, 2H)
    dense_x = dense.reshape(num_graphs, max_nodes, h2)
    h1, h2_, h3, h4_ = (heads[None, :, i * h:(i + 1) * h] for i in range(4))
    h_1 = jnp.concatenate([h1, h2_], axis=0)                   # (2, B, H)
    h_2 = jnp.concatenate([h3, h4_], axis=0)                   # (2, B, H)
    return dense_x, feat, (h_1, h_2)


# --------------------------------------------------------------------------
# Pure-JAX reference (unfused math, original parameters) for correctness.
# --------------------------------------------------------------------------
def gcn_encoder_ref(ids, edge_index, batch, num_graphs, max_nodes, params):
    n = ids.shape[0]
    h = HIDDEN_DIM
    a1, a2 = gcn_adjacency(edge_index, n)
    pool, scat, valid_mask = batch_matrices(batch, num_graphs, max_nodes)
    x = jnp.take(params["emb"], ids, axis=0)
    x1 = a1 @ (x @ params["w1a"]) + params["b1a"]
    x1 = a1 @ (x1 @ params["w1b"]) + params["b1b"]
    x2 = a2 @ (x @ params["w2a"]) + params["b2a"]
    x2 = a2 @ (x2 @ params["w2b"]) + params["b2b"]
    x12 = jnp.concatenate([x1, x2], axis=1)
    g = pool @ x12
    hs = [g @ params[f"w{i}"] + params[f"b_w{i}"] for i in (1, 2, 3, 4)]
    dense = scat @ x12
    feat = jax.nn.relu(dense @ params["w_fc"] + params["b_fc"])
    dense_x = dense.reshape(num_graphs, max_nodes, 2 * h)
    h_1 = jnp.concatenate([hs[0][None], hs[1][None]], axis=0)
    h_2 = jnp.concatenate([hs[2][None], hs[3][None]], axis=0)
    return dense_x, feat, valid_mask, (h_1, h_2)


if __name__ == "__main__":
    N_NODES, NUM_GRAPHS, MAX_NODES, EDGES_PER_GRAPH = 16, 2, 8, 12
    H = HIDDEN_DIM

    key = jax.random.PRNGKey(0)
    k_ids, k_src, k_dst, k_par = jax.random.split(key, 4)

    # src.batch : node -> graph assignment (sorted, 8 nodes per graph)
    batch = jnp.repeat(jnp.arange(NUM_GRAPHS, dtype=jnp.int32), MAX_NODES)

    # src.edge_index : random intra-graph edges, shape (2, E)
    off = (jnp.arange(NUM_GRAPHS, dtype=jnp.int32) * MAX_NODES)[:, None]
    src = jax.random.randint(k_src, (NUM_GRAPHS, EDGES_PER_GRAPH), 0, MAX_NODES,
                             dtype=jnp.int32) + off
    dst = jax.random.randint(k_dst, (NUM_GRAPHS, EDGES_PER_GRAPH), 0, MAX_NODES,
                             dtype=jnp.int32) + off
    edge_index = jnp.stack([src.reshape(-1), dst.reshape(-1)], axis=0)

    # src.x : node token ids
    ids = jax.random.randint(k_ids, (N_NODES,), 0, VOCAB_SIZE, dtype=jnp.int32)

    params = init_params(k_par)

    # One-time preprocessing / weight packing (outside the hot kernel).
    S, P, valid_mask = build_graph_operands(ids, edge_index, batch,
                                            NUM_GRAPHS, MAX_NODES)
    W, B = pack_params(params)

    fwd = jax.jit(functools.partial(gcn_encoder, n=N_NODES,
                                    num_graphs=NUM_GRAPHS, max_nodes=MAX_NODES))
    dense_x, encoder_feature, (h_1, h_2) = fwd(S, P, W, B)
    jax.block_until_ready((dense_x, encoder_feature, h_1, h_2))

    rd, rf, rm, (rh1, rh2) = gcn_encoder_ref(ids, edge_index, batch,
                                             NUM_GRAPHS, MAX_NODES, params)

    assert dense_x.shape == (NUM_GRAPHS, MAX_NODES, 2 * H)
    assert encoder_feature.shape == (NUM_GRAPHS * MAX_NODES, 2 * H)
    assert h_1.shape == (2, NUM_GRAPHS, H) and h_2.shape == (2, NUM_GRAPHS, H)
    assert bool(jnp.all(valid_mask == rm))
    assert jnp.allclose(dense_x, rd, atol=1e-4, rtol=1e-4)
    assert jnp.allclose(encoder_feature, rf, atol=1e-4, rtol=1e-4)
    assert jnp.allclose(h_1, rh1, atol=1e-4, rtol=1e-4)
    assert jnp.allclose(h_2, rh2, atol=1e-4, rtol=1e-4)

    print("KERNEL_OK")
</pallas_src>

<mosaic_0001>
module attributes {stable_mosaic.version = 11 : i64} {
  func.func @_gcn_encoder_kernel(%arg0: memref<16x128xf32, #tpu.memory_space<vmem>>, %arg1: memref<24x16xf32, #tpu.memory_space<vmem>>, %arg2: memref<64x384xf32, #tpu.memory_space<vmem>>, %arg3: memref<8x128xf32, #tpu.memory_space<vmem>>, %arg4: memref<24x128xf32, #tpu.memory_space<vmem>>) attributes {dimension_semantics = [], scalar_prefetch = 0 : i64, scratch_operands = 0 : i64, tpu.core_type = #tpu.core_type<tc>} {
    %c0 = arith.constant 0 : index
    %c0_0 = arith.constant 0 : index
    %0 = vector.load %arg0[%c0, %c0_0] : memref<16x128xf32, #tpu.memory_space<vmem>>, vector<16x64xf32>
    %c0_1 = arith.constant 0 : index
    %c64 = arith.constant 64 : index
    %1 = vector.load %arg0[%c0_1, %c64] : memref<16x128xf32, #tpu.memory_space<vmem>>, vector<16x16xf32>
    %c0_2 = arith.constant 0 : index
    %c80 = arith.constant 80 : index
    %2 = vector.load %arg0[%c0_2, %c80] : memref<16x128xf32, #tpu.memory_space<vmem>>, vector<16x16xf32>
    %c0_3 = arith.constant 0 : index
    %c0_4 = arith.constant 0 : index
    %3 = vector.load %arg2[%c0_3, %c0_4] : memref<64x384xf32, #tpu.memory_space<vmem>>, vector<64x128xf32>
    %c0_5 = arith.constant 0 : index
    %c128 = arith.constant 128 : index
    %4 = vector.load %arg2[%c0_5, %c128] : memref<64x384xf32, #tpu.memory_space<vmem>>, vector<64x64xf32>
    %c0_6 = arith.constant 0 : index
    %c192 = arith.constant 192 : index
    %5 = vector.load %arg2[%c0_6, %c192] : memref<64x384xf32, #tpu.memory_space<vmem>>, vector<64x64xf32>
    %c0_7 = arith.constant 0 : index
    %c256 = arith.constant 256 : index
    %6 = vector.load %arg2[%c0_7, %c256] : memref<64x384xf32, #tpu.memory_space<vmem>>, vector<64x64xf32>
    %7 = tpu.iota {dimensions = array<i32: 1>} : vector<16x64xi32>
    %c32_i32 = arith.constant 32 : i32
    %8 = vector.broadcast %c32_i32 : i32 to vector<16x64xi32>
    %9 = arith.cmpi slt, %7, %8 : vector<16x64xi32>
    %cst = arith.constant dense<0.000000e+00> : vector<16x64xf32>
    %10 = tpu.matmul %0, %4, %cst {dimension_numbers = #tpu.dot_dimension_numbers<[1], [0], [0], [1], [0, 0, 1, 1], [], []>} : vector<16x64xf32>, vector<64x64xf32>, vector<16x64xf32> -> vector<16x64xf32>
    %cst_8 = arith.constant dense<0.000000e+00> : vector<16x64xf32>
    %11 = tpu.matmul %1, %10, %cst_8 {dimension_numbers = #tpu.dot_dimension_numbers<[1], [0], [0], [1], [0, 0, 1, 1], [], []>} : vector<16x16xf32>, vector<16x64xf32>, vector<16x64xf32> -> vector<16x64xf32>
    %cst_9 = arith.constant dense<0.000000e+00> : vector<16x64xf32>
    %12 = tpu.matmul %2, %10, %cst_9 {dimension_numbers = #tpu.dot_dimension_numbers<[1], [0], [0], [1], [0, 0, 1, 1], [], []>} : vector<16x16xf32>, vector<16x64xf32>, vector<16x64xf32> -> vector<16x64xf32>
    %13 = arith.select %9, %11, %12 : vector<16x64xi1>, vector<16x64xf32>
    %c0_10 = arith.constant 0 : index
    %c0_11 = arith.constant 0 : index
    %14 = vector.load %arg3[%c0_10, %c0_11] : memref<8x128xf32, #tpu.memory_space<vmem>>, vector<1x64xf32>
    %15 = vector.broadcast %14 : vector<1x64xf32> to vector<16x64xf32>
    %16 = arith.addf %13, %15 : vector<16x64xf32>
    %cst_12 = arith.constant dense<0.000000e+00> : vector<16x64xf32>
    %17 = tpu.matmul %16, %5, %cst_12 {dimension_numbers = #tpu.dot_dimension_numbers<[1], [0], [0], [1], [0, 0, 1, 1], [], []>} : vector<16x64xf32>, vector<64x64xf32>, vector<16x64xf32> -> vector<16x64xf32>
    %cst_13 = arith.constant dense<0.000000e+00> : vector<16x64xf32>
    %18 = tpu.matmul %1, %17, %cst_13 {dimension_numbers = #tpu.dot_dimension_numbers<[1], [0], [0], [1], [0, 0, 1, 1], [], []>} : vector<16x16xf32>, vector<16x64xf32>, vector<16x64xf32> -> vector<16x64xf32>
    %cst_14 = arith.constant dense<0.000000e+00> : vector<16x64xf32>
    %19 = tpu.matmul %2, %17, %cst_14 {dimension_numbers = #tpu.dot_dimension_numbers<[1], [0], [0], [1], [0, 0, 1, 1], [], []>} : vector<16x16xf32>, vector<16x64xf32>, vector<16x64xf32> -> vector<16x64xf32>
    %20 = arith.select %9, %18, %19 : vector<16x64xi1>, vector<16x64xf32>
    %c1 = arith.constant 1 : index
    %c0_15 = arith.constant 0 : index
    %21 = vector.load %arg3[%c1, %c0_15] : memref<8x128xf32, #tpu.memory_space<vmem>>, vector<1x64xf32>
    %22 = vector.broadcast %21 : vector<1x64xf32> to vector<16x64xf32>
    %23 = arith.addf %20, %22 : vector<16x64xf32>
    %c0_16 = arith.constant 0 : index
    %c0_17 = arith.constant 0 : index
    %24 = vector.load %arg1[%c0_16, %c0_17] : memref<24x16xf32, #tpu.memory_space<vmem>>, vector<24x16xf32>
    %cst_18 = arith.constant dense<0.000000e+00> : vector<24x64xf32>
    %25 = tpu.matmul %24, %23, %cst_18 {dimension_numbers = #tpu.dot_dimension_numbers<[1], [0], [0], [1], [0, 0, 1, 1], [], []>} : vector<24x16xf32>, vector<16x64xf32>, vector<24x64xf32> -> vector<24x64xf32>
    %26 = vector.extract_strided_slice %25 {offsets = [0, 0], sizes = [8, 64], strides = [1, 1]} : vector<24x64xf32> to vector<8x64xf32>
    %27 = vector.extract_strided_slice %25 {offsets = [8, 0], sizes = [16, 64], strides = [1, 1]} : vector<24x64xf32> to vector<16x64xf32>
    %cst_19 = arith.constant dense<0.000000e+00> : vector<8x128xf32>
    %28 = tpu.matmul %26, %3, %cst_19 {dimension_numbers = #tpu.dot_dimension_numbers<[1], [0], [0], [1], [0, 0, 1, 1], [], []>} : vector<8x64xf32>, vector<64x128xf32>, vector<8x128xf32> -> vector<8x128xf32>
    %c3 = arith.constant 3 : index
    %c0_20 = arith.constant 0 : index
    %29 = vector.load %arg3[%c3, %c0_20] : memref<8x128xf32, #tpu.memory_space<vmem>>, vector<1x128xf32>
    %30 = vector.broadcast %29 : vector<1x128xf32> to vector<8x128xf32>
    %31 = arith.addf %28, %30 : vector<8x128xf32>
    %cst_21 = arith.constant dense<0.000000e+00> : vector<16x64xf32>
    %32 = tpu.matmul %27, %6, %cst_21 {dimension_numbers = #tpu.dot_dimension_numbers<[1], [0], [0], [1], [0, 0, 1, 1], [], []>} : vector<16x64xf32>, vector<64x64xf32>, vector<16x64xf32> -> vector<16x64xf32>
    %c2 = arith.constant 2 : index
    %c0_22 = arith.constant 0 : index
    %33 = vector.load %arg3[%c2, %c0_22] : memref<8x128xf32, #tpu.memory_space<vmem>>, vector<1x64xf32>
    %34 = vector.broadcast %33 : vector<1x64xf32> to vector<16x64xf32>
    %35 = arith.addf %32, %34 : vector<16x64xf32>
    %cst_23 = arith.constant 0.000000e+00 : f32
    %36 = vector.broadcast %cst_23 : f32 to vector<16x64xf32>
    %37 = arith.maximumf %35, %36 : vector<16x64xf32>
    %c0_24 = arith.constant 0 : index
    %c0_25 = arith.constant 0 : index
    %38 = vector.load %arg4[%c0_24, %c0_25] : memref<24x128xf32, #tpu.memory_space<vmem>>, vector<8x128xf32>
    tpu.vector_store %arg4[%c0_24, %c0_25], %31 {strides = array<i32>} : memref<24x128xf32, #tpu.memory_space<vmem>>, vector<8x128xf32>,
    %39 = tpu.concatenate %27, %37 in 1 : vector<16x64xf32>, vector<16x64xf32> -> vector<16x128xf32>
    %c8 = arith.constant 8 : index
    %c0_26 = arith.constant 0 : index
    %40 = vector.load %arg4[%c8, %c0_26] : memref<24x128xf32, #tpu.memory_space<vmem>>, vector<16x128xf32>
    tpu.vector_store %arg4[%c8, %c0_26], %39 {strides = array<i32>} : memref<24x128xf32, #tpu.memory_space<vmem>>, vector<16x128xf32>,
    return
  }
}

</mosaic_0001>

<bundles_post_ra>
// kernel: gcn_encoder.1
= control target key start
LH: loop header
LB: loop body
LE: loop exit
PB: predicated region body
PF: predicated region fallthrough
CT: control target
= control target key end

     0   :  { %9 = vsyncpa [#allocation3], 0  ;;  %s1196_s15 = smov [#allocation2]   ;;  %s1313_s0 = inlined_call_operand.vmem [shape: f32[16,128], index: 0, kind: input, shape index: {}]   ;;  %s1314_s1 = inlined_call_operand.vmem [shape: f32[24,16], index: 1, kind: input, shape index: {}]   ;;  %s1315_s2 = inlined_call_operand.hbm [shape: f32[64,384], index: 2, kind: input, shape index: {}]   ;;  %s1316_s3 = inlined_call_operand.vmem [shape: f32[8,128], index: 3, kind: input, shape index: {}]   ;;  %s1317_s4 = inlined_call_operand.vmem [shape: f32[24,128], index: 4, kind: output, shape index: {}]  }
   0x1   :  { %s19_s16 = sshll.u32 %s1196_s15, 4  ;;  %s1172_s19 = scalar_lea.hbm %s1315_s2, 3072  ;;  %s20_s16 = int_to_ptr.vmem [resolvable:$true] %s19_s16 }
   0x2   :  { %p1173_p0 = scmp.ne.s32.totalorder %s1315_s2, %s1172_s19  ;;  %p1176_p1 = scmp.lt.u32.totalorder %s1172_s19, %s1315_s2 }
   0x4   :  { %p1178_p2 = pnand %p1176_p1, %p1173_p0 }
   0x6   :  { %1181 = shalt.err (!%p1178_p2)
}
   0x7   :  { %s1182_s24 = scalar_lea.vmem %s20_s16, 3072  ;;  %p1187_p4 = scmp.lt.s32.totalorder %s20_s16, %s20_s16 }
   0x8   :  { %p1183_p3 = scmp.ne.s32.totalorder %s20_s16, %s1182_s24  ;;  %p1188_p5 = scmp.lt.s32.totalorder %s1182_s24, %s1182_s24 }
   0xa   :  { %p1189_p6 = por %p1188_p5, %p1187_p4 }
   0xc   :  { %p1190_p7 = pnand %p1189_p6, %p1183_p3 }
   0xe   :  { %1193 = shalt.err (!%p1190_p7)
}
   0xf   :  { %s1197_s25 = smov 384   ;;  %s1198_s26 = smov 24  }
  0x10   :  { %25 = dma.hbm_to_vmem [thread:$0]  %s1315_s2, 3072, %s20_s16, [#allocation3], %s1197_s25, %s1197_s25, %s1198_s26  }
  0x11   :  { %1194 = dma.done.wait [#allocation3], 3072  }
  0x12   :  { %1195 = vsyncadd [#allocation3], 4294964224  ;;  %v41_v0 = vld [vmem:[#allocation2 + $0x8] sm:$0xff]  ;;  %v42_v1 = vld [vmem:[#allocation2 + $0x20] sm:$0xff]  ;;  %vm60_vm0 = vcmask 523264   ;;  %s1199_s2 = smov 64   ;;  %v57_v41 = vlaneseq }
  0x13   :  { %v43_v2 = vld [vmem:[#allocation2 + $0x38] sm:$0xff]  ;;  %v1065_v3 = vpack.c.bf16 %v42_v1, %v41_v0  ;;  %v44_v4 = vld [vmem:[#allocation2 + $0x50] sm:$0xff]  ;;  %v45_v6 = vld [vmem:[#allocation2 + $0x68] sm:$0xff]  ;;  %s1200_s5 = smov 48   ;;  %v1152_v13 = vpack.i.bf16 %v42_v1, %v41_v0  ;;  %vm146_vm1 = vcmask 130048   ;;  %v1201_v55 = vmov 0.0|0.0  }
  0x14   :  { %v1069_v5 = vpack.c.bf16 %v44_v4, %v43_v2  ;;  %v46_v7 = vld [vmem:[#allocation2 + $0x80] sm:$0xff]  ;;  %v47_v10 = vld [vmem:[#allocation2 + $0x98] sm:$0xff]  ;;  %v48_v11 = vld [vmem:[#allocation2 + $0xb0] sm:$0xff]  ;;  %v1157_v15 = vpack.i.bf16 %v44_v4, %v43_v2  ;;  %v58_v42 = vand.u32 127, %v57_v41  ;;  %vm1202_vm3 = vmmov 0  }
  0x15   :  { %v31_v8 = vld [vmem:[%s1313_s0] sm:$0xff]  ;;  %1066 = vmatprep.subr.bf16.mxu0 %v1065_v3  ;;  %v1073_v9 = vpack.c.bf16 %v46_v7, %v45_v6  ;;  %v32_v12 = vld [vmem:[%s1313_s0 + $0x8] sm:$0xff]  ;;  %v1077_v14 = vpack.c.bf16 %v48_v11, %v47_v10  ;;  %v1162_v16 = vpack.i.bf16 %v46_v7, %v45_v6  ;;  %v1167_v17 = vpack.i.bf16 %v48_v11, %v47_v10  ;;  %v34_v58 = vld [vmem:[#allocation2 + $0x18] sm:$0xff] }
  0x16   :  { %964 = vmatprep.mubr.msk.f32.mxu0 %vm60_vm0, %v31_v8  ;;  %1068 = vmatpush3.bf16.msra.mxu0 %v1065_v3  ;;  %vm59_vm2 = vcmp.lt.s32.totalorder %v58_v42, 32  ;;  %v872_v46 = vld [vmem:[%s1316_s3] ss:$0 sm:$0xff]  ;;  %v1203_v56 = vmov 0.0   ;;  %v35_v59 = vld [vmem:[#allocation2 + $0x30] sm:$0xff]  ;;  %v36_v61 = vld [vmem:[#allocation2 + $0x48] sm:$0xff] }
  0x17   :  { %142 = vrot.lane.b32.xlu0 %v31_v8, %s1199_s2  ;;  %1070 = vmatprep.subr.bf16.mxu0 %v1069_v5  ;;  %v33_v57 = vld [vmem:[#allocation2] sm:$0xff]  ;;  %v1120_v62 = vpack.c.bf16 %v36_v61, %v35_v59  ;;  %v38_v0 = vld [vmem:[#allocation2 + $0x78] sm:$0xff]  ;;  %v39_v2 = vld [vmem:[#allocation2 + $0x90] sm:$0xff] }
  0x18   :  { %226 = vrot.lane.b32.xlu1 %v31_v8, %s1200_s5  ;;  %v1117_v60 = vpack.c.bf16 %v34_v58, %v33_v57  ;;  %v37_v63 = vld [vmem:[#allocation2 + $0x60] sm:$0xff]  ;;  %v40_v3 = vld [vmem:[#allocation2 + $0xa8] sm:$0xff]  ;;  %v49_v11 = vld [vmem:[#allocation2 + $0x10] sm:$0xff] }
  0x19   :  { %v1123_v1 = vpack.c.bf16 %v38_v0, %v37_v63  ;;  %v1126_v4 = vpack.c.bf16 %v40_v3, %v39_v2  ;;  %v879_v7 = vld [vmem:[%s1316_s3 + $0x1] ss:$0 sm:$0xff] }
  0x1a   :  { %1072 = vmatpush3.bf16.msra.mxu0 %v1069_v5 }
  0x1b   :  { %144 = vrot.lane.b32.xlu0 %v32_v12, %s1199_s2  ;;  %1074 = vmatprep.subr.bf16.mxu0 %v1073_v9 }
  0x1c   :  { %228 = vrot.lane.b32.xlu1 %v32_v12, %s1200_s5 }
  0x1e   :  { %1076 = vmatpush3.bf16.msra.mxu0 %v1073_v9 }
  0x1f   :  { %1153 = vrot.lane.b32.xlu0 %v1152_v13, %s1199_s2  ;;  %1078 = vmatprep.subr.bf16.mxu0 %v1077_v14 }
  0x20   :  { %1158 = vrot.lane.b32.xlu1 %v1157_v15, %s1199_s2 }
  0x22   :  { %1080 = vmatpush3.bf16.msra.mxu0 %v1077_v14 }
  0x23   :  { %1163 = vrot.lane.b32.xlu0 %v1162_v16, %s1199_s2 }
  0x24   :  { %1168 = vrot.lane.b32.xlu1 %v1167_v17, %s1199_s2 }
  0x25   :  { %965 = vmatmul.mubr.msk.f32.vlgmr.msra.gmra.mrb[0].mxu0 %vm60_vm0, %v32_v12  ;;  %v50_v12 = vld [vmem:[#allocation2 + $0x28] sm:$0xff] }
  0x26   :  { %v1128_v16 = vpack.c.bf16 %v50_v12, %v49_v11 }
  0x89   :  { %v143_v18 = vpop.permute.xlu0 %142 }
  0x8a   :  { %971 = vmatprep.mubr.msk.f32.mxu1 %vm146_vm1, %v143_v18  ;;  %1004 = vmatprep.mubr.msk.f32.mxu0 %vm146_vm1, %v143_v18  ;;  %v227_v19 = vpop.permute.xlu1 %226  ;;  %v51_v18 = vld [vmem:[#allocation2 + $0x40] sm:$0xff] }
  0x8d   :  { %v145_v20 = vpop.permute.xlu0 %144 }
  0x8e   :  { %v229_v21 = vpop.permute.xlu1 %228 }
  0x91   :  { %v1154_v22 = vpop.permute.xlu0 %1153 }
  0x92   :  { %v1156_v26 = vunpack.i.h.bf16 %v1154_v22  ;;  %v1155_v27 = vunpack.i.l.bf16 %v1154_v22  ;;  %v1159_v28 = vpop.permute.xlu1 %1158  ;;  %v591_v22 = vld [vmem:[%s1314_s1 + $0x8] sm:$0xff] }
  0x93   :  { %v1161_v30 = vunpack.i.h.bf16 %v1159_v28  ;;  %v1160_v31 = vunpack.i.l.bf16 %v1159_v28  ;;  %v56_v28 = vld [vmem:[#allocation2 + $0xb8] sm:$0xff] }
  0x94   :  { %v1089_v29 = vpack.c.bf16 %v1156_v26, %v1155_v27  ;;  %v55_v27 = vld [vmem:[#allocation2 + $0xa0] sm:$0xff] }
  0x95   :  { %v1164_v32 = vpop.permute.xlu0 %1163  ;;  %v1093_v33 = vpack.c.bf16 %v1161_v30, %v1160_v31 }
  0x96   :  { %v1166_v34 = vunpack.i.h.bf16 %v1164_v32  ;;  %v1165_v35 = vunpack.i.l.bf16 %v1164_v32  ;;  %v1169_v36 = vpop.permute.xlu1 %1168 }
  0x97   :  { %v1171_v38 = vunpack.i.h.bf16 %v1169_v36  ;;  %v1170_v39 = vunpack.i.l.bf16 %v1169_v36  ;;  %v883_v36 = vld [vmem:[%s1316_s3 + $0x3] ss:$0 sm:$0xff] }
  0x98   :  { %v1097_v37 = vpack.c.bf16 %v1166_v34, %v1165_v35 }
  0x99   :  { %v1101_v40 = vpack.c.bf16 %v1171_v38, %v1170_v39 }
  0xf8   :  { %v966_v23 = vpop.f32.mrb[0].mxu0 }
  0xf9   :  { %v133_v24 = vpop.f32.mrb[1].mxu0 }
  0xfa   :  { %v1081_v25 = vpack.c.bf16 %v966_v23, %v133_v24  ;;  %v592_v23 = vld [vmem:[%s1314_s1 + $0x10] sm:$0xff] }
  0xfb   :  { %v53_v24 = vld [vmem:[#allocation2 + $0x70] sm:$0xff] }
  0xfc   :  { %1082 = vmatprep.subr.bf16.mxu1 %v1081_v25 }
  0xfd   :  { %1084 = vmatpush3.bf16.msra.mxu1 %v1081_v25 }
  0xfe   :  { %1086 = vmatprep.subr.bf16.mxu1 %v1081_v25 }
 0x100   :  { %972 = vmatmul.mubr.msk.f32.vlgmr.msra.gmra.mrb[0].mxu1 %vm146_vm1, %v145_v20 }
 0x101   :  { %1088 = vmatpush3.bf16.msra.mxu1 %v1081_v25  ;;  %978 = vmatprep.mubr.msk.f32.mxu1 %vm146_vm1, %v227_v19  ;;  %v54_v25 = vld [vmem:[#allocation2 + $0x88] sm:$0xff] }
 0x102   :  { %1090 = vmatprep.subr.bf16.mxu1 %v1089_v29  ;;  %v1136_v26 = vpack.c.bf16 %v54_v25, %v53_v24 }
 0x104   :  { %979 = vmatmul.mubr.msk.f32.vlgmr.msra.gmra.mrb[2].mxu1 %vm146_vm1, %v229_v21 }
 0x105   :  { %1092 = vmatpush3.bf16.msra.mxu1 %v1089_v29  ;;  %v1140_v29 = vpack.c.bf16 %v56_v28, %v55_v27 }
 0x106   :  { %1094 = vmatprep.subr.bf16.mxu1 %v1093_v33 }
 0x109   :  { %1096 = vmatpush3.bf16.msra.mxu1 %v1093_v33 }
 0x10a   :  { %1098 = vmatprep.subr.bf16.mxu1 %v1097_v37 }
 0x10d   :  { %1100 = vmatpush3.bf16.msra.mxu1 %v1097_v37 }
 0x10e   :  { %1102 = vmatprep.subr.bf16.mxu1 %v1101_v40 }
 0x111   :  { %1104 = vmatpush3.bf16.msra.mxu1 %v1101_v40  ;;  %v885_v40 = vld [vmem:[%s1316_s3 + $0x2] ss:$0 sm:$0xff] }
 0x112   :  { %1116 = vmatprep.subr.bf16.mxu1 %v1201_v55 }
 0x1d3   :  { %v973_v43 = vpop.f32.mrb[0].mxu1 }
 0x1d4   :  { %v217_v44 = vpop.f32.mrb[1].mxu1 }
 0x1d7   :  { %v980_v45 = vpop.f32.mrb[2].mxu1 }
 0x1d8   :  { %v310_v47 = vsel %vm59_vm2, %v973_v43, %v980_v45  ;;  %v300_v48 = vpop.f32.mrb[3].mxu1 }
 0x1d9   :  { %v309_v49 = vsel %vm59_vm2, %v217_v44, %v300_v48  ;;  %v317_v51 = vadd.f32 %v872_v46, %v310_v47 }
 0x1da   :  { %v316_v50 = vadd.f32 %v872_v46, %v309_v49 }
 0x1dc   :  { %997 = vmatprep.mubr.msk.f32.mxu1 %vm60_vm0, %v316_v50 }
 0x1dd   :  { %998 = vmatmul.mubr.msk.f32.vlgmr.msra.gmra.mrb[4].mxu1 %vm60_vm0, %v317_v51 }
 0x1de   :  { %1043 = vmatprep.mubr.msk.f32.mxu1 %vm1202_vm3, %v1203_v56  ;;  %1118 = vmatpush3.bf16.msra.mxu1 %v1117_v60 }
 0x1df   :  { %1119 = vmatprep.subr.bf16.mxu1 %v1201_v55 }
 0x1e2   :  { %1121 = vmatpush3.bf16.msra.mxu1 %v1120_v62 }
 0x1e3   :  { %1122 = vmatprep.subr.bf16.mxu1 %v1201_v55 }
 0x1e6   :  { %1124 = vmatpush3.bf16.msra.mxu1 %v1123_v1 }
 0x1e7   :  { %1125 = vmatprep.subr.bf16.mxu1 %v1201_v55 }
 0x1ea   :  { %1127 = vmatpush3.bf16.msra.mxu1 %v1126_v4 }
 0x2b0   :  { %v999_v52 = vpop.f32.mrb[4].mxu1 }
 0x2b1   :  { %v422_v53 = vpop.f32.mrb[5].mxu1 }
 0x2b2   :  { %v1105_v54 = vpack.c.bf16 %v999_v52, %v422_v53 }
 0x2b4   :  { %1106 = vmatprep.subr.bf16.mxu0 %v1105_v54 }
 0x2b5   :  { %1108 = vmatpush3.bf16.msra.mxu0 %v1105_v54 }
 0x2b6   :  { %1110 = vmatprep.subr.bf16.mxu0 %v1105_v54 }
 0x2b8   :  { %1005 = vmatmul.mubr.msk.f32.vlgmr.msra.gmra.mrb[2].mxu0 %vm146_vm1, %v145_v20  ;;  %v590_v20 = vld [vmem:[%s1314_s1] sm:$0xff] }
 0x2b9   :  { %1112 = vmatpush3.bf16.msra.mxu0 %v1105_v54  ;;  %1011 = vmatprep.mubr.msk.f32.mxu0 %vm146_vm1, %v227_v19  ;;  %v52_v19 = vld [vmem:[#allocation2 + $0x58] sm:$0xff] }
 0x2ba   :  { %1113 = vmatprep.subr.bf16.mxu0 %v1201_v55 }
 0x2bc   :  { %1012 = vmatmul.mubr.msk.f32.vlgmr.msra.gmra.mrb[4].mxu0 %vm146_vm1, %v229_v21  ;;  %v1132_v21 = vpack.c.bf16 %v52_v19, %v51_v18 }
 0x2bd   :  { %1018 = vmatprep.mubr.msk.f32.mxu0 %vm1202_vm3, %v1203_v56 }
 0x38b   :  { %v1006_v5 = vpop.f32.mrb[2].mxu0 }
 0x38c   :  { %v497_v6 = vpop.f32.mrb[3].mxu0 }
 0x38f   :  { %v1013_v8 = vpop.f32.mrb[4].mxu0 }
 0x390   :  { %v582_v9 = vsel %vm59_vm2, %v1006_v5, %v1013_v8  ;;  %v572_v10 = vpop.f32.mrb[5].mxu0 }
 0x391   :  { %v589_v13 = vadd.f32 %v879_v7, %v582_v9  ;;  %v581_v14 = vsel %vm59_vm2, %v497_v6, %v572_v10 }
 0x392   :  { %v588_v15 = vadd.f32 %v879_v7, %v581_v14 }
 0x394   :  { %v1114_v17 = vpack.c.bf16 %v589_v13, %v588_v15 }
 0x396   :  { %1115 = vmatpush3.bf16.msra.mxu0 %v1114_v17 }
 0x397   :  { %1129 = vmatprep.subr.bf16.mxu0 %v1128_v16 }
 0x399   :  { %1019 = vmatmul.mubr.msk.f32.vlgmr.msra.gmra.mrb[6].mxu0 %vm146_vm1, %v590_v20 }
 0x39a   :  { %1021 = vmatprep.mubr.msk.f32.mxu0 %vm1202_vm3, %v1203_v56  ;;  %1131 = vmatpush3.bf16.msra.mxu0 %v1128_v16 }
 0x39b   :  { %1133 = vmatprep.subr.bf16.mxu0 %v1132_v21 }
 0x39d   :  { %1022 = vmatmul.mubr.msk.f32.gmra.mrb[8].mxu0 %vm146_vm1, %v591_v22 }
 0x39e   :  { %1024 = vmatprep.mubr.msk.f32.mxu0 %vm1202_vm3, %v1203_v56  ;;  %1135 = vmatpush3.bf16.msra.mxu0 %v1132_v21 }
 0x39f   :  { %1137 = vmatprep.subr.bf16.mxu0 %v1136_v26 }
 0x3a1   :  { %1025 = vmatmul.mubr.msk.f32.gmra.mrb[10].mxu0 %vm146_vm1, %v592_v23 }
 0x3a2   :  { %1139 = vmatpush3.bf16.msra.mxu0 %v1136_v26 }
 0x3a3   :  { %1141 = vmatprep.subr.bf16.mxu0 %v1140_v29 }
 0x3a6   :  { %1143 = vmatpush3.bf16.msra.mxu0 %v1140_v29 }
 0x46c   :  { %v668_v30 = vpop.f32.mrb[6].mxu0 }
 0x46d   :  { %v1020_v31 = vpop.f32.mrb[7].mxu0  ;;  %1044 = vmatmul.mubr.msk.f32.vlgmr.msra.gmra.mrb[6].mxu1 %vm60_vm0, %v668_v30 }
 0x470   :  { %v673_v32 = vpop.f32.mrb[8].mxu0 }
 0x471   :  { %v1023_v33 = vpop.f32.mrb[9].mxu0  ;;  %1062 = vmatprep.mubr.msk.f32.mxu0 %vm60_vm0, %v673_v32 }
 0x474   :  { %v678_v34 = vpop.f32.mrb[10].mxu0 }
 0x475   :  { %v1026_v35 = vpop.f32.mrb[11].mxu0  ;;  %1063 = vmatmul.mubr.msk.f32.vlgmr.msra.gmra.mrb[12].mxu0 %vm60_vm0, %v678_v34 }
 0x540   :  { %v756_v37 = vpop.f32.mrb[6].mxu1 }
 0x541   :  { %v757_v38 = vadd.f32 %v883_v36, %v756_v37  ;;  %v1045_v39 = vpop.f32.mrb[7].mxu1 }
 0x543   :  { %848 = vst [vmem:[%s1317_s4] sm:$0xff] %v757_v38 }
 0x548   :  { %v1064_v41 = vpop.f32.mrb[12].mxu0 }
 0x549   :  { %v843_v42 = vadd.f32 %v1064_v41, %v885_v40  ;;  %v837_v43 = vpop.f32.mrb[13].mxu0 }
 0x54a   :  { %v838_v44 = vadd.f32 %v885_v40, %v837_v43 }
 0x54b   :  { %v847_v45 = vmax.f32 %v843_v42, 0.0 }
 0x54c   :  { %v846_v46 = vmax.f32 %v838_v44, 0.0 }
 0x54d   :  { %853 = vrot.lane.b32.xlu1 %v847_v45, %s1199_s2 }
 0x54e   :  { %851 = vrot.lane.b32.xlu0 %v846_v46, %s1199_s2 }
 0x5bf   :  { %v854_v47 = vpop.permute.xlu1 %853 }
 0x5c0   :  { %v858_v48 = vsel %vm60_vm0, %v678_v34, %v854_v47  ;;  %v852_v49 = vpop.permute.xlu0 %851 }
 0x5c1   :  { %860 = vst [vmem:[%s1317_s4 + $0x10] sm:$0xff] %v858_v48  ;;  %v857_v50 = vsel %vm60_vm0, %v673_v32, %v852_v49 }
 0x5c2   :  { %859 = vst [vmem:[%s1317_s4 + $0x8] sm:$0xff] %v857_v50 }
 0x5c3   :  { %865 = vsyncpa [#allocation3], 1 }

</bundles_post_ra>
